<compile_context>
chip_gen: v5e
topology: v5e:2x2
jax: 0.10.0
libtpu: 0.0.40
codegen_flags: <defaults>
</compile_context>

<pallas_src>
import functools
from typing import NamedTuple

import jax
import jax.numpy as jnp
from jax.experimental import pallas as pl
from jax.experimental.pallas import tpu as pltpu


def _round_up(n, m):
    return (n + m - 1) // m * m


def _cdiv(a, b):
    return (a + b - 1) // b


class Dims(NamedTuple):
    input_dim: int
    h1: int
    h2: int
    h3: int
    h4: int
    out_dim: int
    ch: int  # padded lane width of every layer output (multiple of 128)


_BROW = 16  # bf16 sublane tile; keep every packed region 16-row aligned


def _ksizes(d: Dims):
    r = lambda n: _round_up(n, _BROW)
    return r(d.input_dim), r(d.h1), r(d.h2), r(d.h3), r(d.h4)


def _trunk_offsets(d: Dims):
    kin, k1, k2, _, _ = _ksizes(d)
    o_w1 = 0
    o_b1 = o_w1 + kin
    o_w2 = o_b1 + _BROW
    o_b2 = o_w2 + k1
    o_w3 = o_b2 + _BROW
    o_b3 = o_w3 + k2
    rows = o_b3 + _BROW
    return o_w1, o_b1, o_w2, o_b2, o_w3, o_b3, rows


def _expert_offsets(d: Dims):
    _, _, _, k3, k4 = _ksizes(d)
    o_w4 = 0
    o_b4 = o_w4 + k3
    o_wh = o_b4 + _BROW
    o_bh = o_wh + k4
    rows = o_bh + _BROW
    return o_w4, o_b4, o_wh, o_bh, rows


def _make_kernel(d: Dims):
    o_w1, o_b1, o_w2, o_b2, o_w3, o_b3, _ = _trunk_offsets(d)
    o_w4, o_b4, o_wh, o_bh, _ = _expert_offsets(d)
    _, k1, k2, k3, k4 = _ksizes(d)

    def kernel(eid_ref, x_ref, trunk_ref, exp_ref, out_ref):
        del eid_ref  # expert id is consumed only by the experts index_map
        bf16 = jnp.bfloat16

        def layer(h, w_ref, o_w, k, o_b):
            # bf16 operands into the MXU, f32 accumulation, f32 bias add.
            w = w_ref[o_w:o_w + k, :]                        # (k, ch), static slice
            b = w_ref[o_b:o_b + 1, :].astype(jnp.float32)    # (1, ch) bias row
            return jnp.dot(h.astype(bf16), w,
                           preferred_element_type=jnp.float32) + b

        h = jnp.maximum(layer(x_ref[...], trunk_ref, o_w1, d.input_dim, o_b1), 0.0)
        h = jnp.maximum(layer(h[:, :k1], trunk_ref, o_w2, k1, o_b2), 0.0)
        h = jnp.maximum(layer(h[:, :k2], trunk_ref, o_w3, k2, o_b3), 0.0)
        h = jnp.maximum(layer(h[:, :k3], exp_ref, o_w4, k3, o_b4), 0.0)
        # Fused [mu || std] head: one matmul, one lane-dense (block_b, ch) store.
        out = layer(h[:, :k4], exp_ref, o_wh, k4, o_bh)
        out_ref[...] = out.astype(out_ref.dtype)

    return kernel


@functools.partial(jax.jit, static_argnames=("dims",))
def _forward_impl(trunk, experts, expert_idx, x, *, dims):
    d = dims
    batch = x.shape[0]
    x = x.astype(jnp.float32)

    # Batch tiling: fat blocks (<=512 rows) amortize the ~0.35 us per grid
    # step; large batches are split into >=2 blocks so v7x's two TensorCores
    # both get work on the "parallel" axis.
    batch8 = _round_up(batch, 8)
    if batch8 <= 256:
        block_b = batch8
    else:
        block_b = min(512, _round_up(_cdiv(batch8, 2), 8))
    nb = _cdiv(batch8, block_b)
    batch_p = nb * block_b

    # Pad batch only; x keeps its real feature width (no lane padding op).
    if batch_p != batch:
        x = jnp.pad(x, ((0, batch_p - batch), (0, 0)))

    r_trunk = trunk.shape[0]
    r_exp = experts.shape[1]
    kernel = _make_kernel(d)

    kin, k1, k2, k3, k4 = _ksizes(d)
    flops = 2 * batch_p * d.ch * (d.input_dim + k1 + k2 + k3 + k4)
    bytes_accessed = (4 * x.size + 2 * trunk.size + 2 * r_exp * d.ch
                      + 4 * batch_p * d.ch)

    out = pl.pallas_call(
        kernel,
        out_shape=jax.ShapeDtypeStruct((batch_p, d.ch), jnp.float32),
        grid_spec=pltpu.PrefetchScalarGridSpec(
            num_scalar_prefetch=1,
            grid=(nb,),
            in_specs=[
                # x: last block dim == full array dim (legal even though <128).
                pl.BlockSpec((block_b, d.input_dim), lambda b, eid: (b, 0)),
                # Constant index_map -> trunk slab DMA'd once, resident for all steps.
                pl.BlockSpec((r_trunk, d.ch), lambda b, eid: (0, 0)),
                # Expert slab selected at runtime via scalar-prefetched id.
                pl.BlockSpec((None, r_exp, d.ch), lambda b, eid: (eid[0], 0, 0)),
            ],
            out_specs=pl.BlockSpec((block_b, d.ch), lambda b, eid: (b, 0)),
        ),
        compiler_params=pltpu.CompilerParams(
            dimension_semantics=("parallel",)),
        cost_estimate=pl.CostEstimate(
            flops=flops, transcendentals=0, bytes_accessed=bytes_accessed),
    )(expert_idx, x, trunk, experts)

    # One contiguous slice of the meaningful lanes, then split into mu / std.
    head = out[:batch, :2 * d.out_dim]
    return head[:, :d.out_dim], head[:, d.out_dim:]


def actor_forward(packed, expert, x):
    """Pallas forward: (expert, x) -> (mu, std). One compiled kernel for all experts."""
    # TODO(synk): if this runs every RL step, keep the trunk/expert slabs
    # resident across calls (cross-pallas_call prefetch) instead of re-DMAing.
    idx = jnp.array([packed["expert_ids"][expert]], jnp.int32)
    return _forward_impl(packed["trunk"], packed["experts"], idx, x,
                         dims=packed["dims"])


# ---------------------------------------------------------------------------
# Parameter construction / packing (host side, done once).
# Weights are stored as (in, out) = transpose of torch.nn.Linear.weight.
# ---------------------------------------------------------------------------
def init_params(key, input_dim, h1, h2, h3, h4, output_dim, expert_policies):
    def linear(key, fan_in, fan_out):
        kw, kb = jax.random.split(key)
        bound = 1.0 / jnp.sqrt(fan_in)
        w = jax.random.uniform(kw, (fan_in, fan_out), jnp.float32, -bound, bound)
        b = jax.random.uniform(kb, (fan_out,), jnp.float32, -bound, bound)
        return w, b

    keys = jax.random.split(key, 3 + 3 * len(expert_policies))
    raw = {}
    raw["w1"], raw["b1"] = linear(keys[0], input_dim, h1)
    raw["w2"], raw["b2"] = linear(keys[1], h1, h2)
    raw["w3"], raw["b3"] = linear(keys[2], h2, h3)
    raw["experts"] = {}
    for i, identity in enumerate(expert_policies):
        w4, b4 = linear(keys[3 + 3 * i], h3, h4)
        wmu, bmu = linear(keys[4 + 3 * i], h4, output_dim)
        wstd, bstd = linear(keys[5 + 3 * i], h4, output_dim)
        raw["experts"][identity] = (w4, b4, wmu, bmu, wstd, bstd)
    return raw


def pack_params(raw, dims, expert_policies):
    """Pack trunk into one slab and each expert into one slab (bf16, 16-row aligned)."""
    d = dims
    o_w1, o_b1, o_w2, o_b2, o_w3, o_b3, r_trunk = _trunk_offsets(d)
    trunk = jnp.zeros((r_trunk, d.ch), jnp.float32)
    trunk = trunk.at[o_w1:o_w1 + d.input_dim, :d.h1].set(raw["w1"])
    trunk = trunk.at[o_b1, :d.h1].set(raw["b1"])
    trunk = trunk.at[o_w2:o_w2 + d.h1, :d.h2].set(raw["w2"])
    trunk = trunk.at[o_b2, :d.h2].set(raw["b2"])
    trunk = trunk.at[o_w3:o_w3 + d.h2, :d.h3].set(raw["w3"])
    trunk = trunk.at[o_b3, :d.h3].set(raw["b3"])

    o_w4, o_b4, o_wh, o_bh, r_exp = _expert_offsets(d)
    exp_bufs, expert_ids = [], {}
    for i, identity in enumerate(expert_policies):
        w4, b4, wmu, bmu, wstd, bstd = raw["experts"][identity]
        buf = jnp.zeros((r_exp, d.ch), jnp.float32)
        buf = buf.at[o_w4:o_w4 + d.h3, :d.h4].set(w4)
        buf = buf.at[o_b4, :d.h4].set(b4)
        buf = buf.at[o_wh:o_wh + d.h4, :d.out_dim].set(wmu)
        buf = buf.at[o_wh:o_wh + d.h4, d.out_dim:2 * d.out_dim].set(wstd)
        buf = buf.at[o_bh, :d.out_dim].set(bmu)
        buf = buf.at[o_bh, d.out_dim:2 * d.out_dim].set(bstd)
        exp_bufs.append(buf)
        expert_ids[identity] = i
    # bf16 storage: half the weight DMA and the MXU's native input dtype.
    return {"trunk": trunk.astype(jnp.bfloat16),
            "experts": jnp.stack(exp_bufs, axis=0).astype(jnp.bfloat16),
            "expert_ids": expert_ids, "dims": d}


def reference_forward(raw, expert, x):
    """Pure-JAX f32 reference (unpacked params) for correctness checking."""
    h = jnp.maximum(x @ raw["w1"] + raw["b1"], 0.0)
    h = jnp.maximum(h @ raw["w2"] + raw["b2"], 0.0)
    h = jnp.maximum(h @ raw["w3"] + raw["b3"], 0.0)
    w4, b4, wmu, bmu, wstd, bstd = raw["experts"][expert]
    h = jnp.maximum(h @ w4 + b4, 0.0)
    return h @ wmu + bmu, h @ wstd + bstd


if __name__ == "__main__":
    batch = 8
    input_dim = 16
    h1 = h2 = h3 = h4 = 32
    output_dim = 8
    expert_policies = ["expA", "expB"]

    key = jax.random.PRNGKey(0)
    kp, kx = jax.random.split(key)
    raw = init_params(kp, input_dim, h1, h2, h3, h4, output_dim, expert_policies)

    ch = _round_up(max(h1, h2, h3, h4, 2 * output_dim), 128)
    dims = Dims(input_dim, h1, h2, h3, h4, output_dim, ch)
    packed = pack_params(raw, dims, expert_policies)

    x = jax.random.normal(kx, (batch, input_dim), jnp.float32)

    ok = True
    for expert in expert_policies:  # exercises the scalar-prefetch expert select
        mu, std = actor_forward(packed, expert, x)
        mu, std = jax.block_until_ready((mu, std))
        mu_ref, std_ref = reference_forward(raw, expert, x)
        # bf16 weights/activations on the MXU vs. f32 reference: loose tolerance.
        ok &= bool(jnp.allclose(mu, mu_ref, atol=5e-2, rtol=5e-2))
        ok &= bool(jnp.allclose(std, std_ref, atol=5e-2, rtol=5e-2))
    assert ok

    # TODO(synk): the `action()` stochastic sampling path (np.random.normal +
    # tanh squashing) is not part of forward(); only forward(expert, x) is implemented.
    print("KERNEL_OK")
</pallas_src>

<mosaic_0001>
module attributes {stable_mosaic.version = 11 : i64} {
  func.func @kernel(%arg0: i32, %arg1: memref<1xi32, #tpu.memory_space<smem>>, %arg2: memref<8x16xf32, #tpu.memory_space<vmem>>, %arg3: memref<128x128xbf16, #tpu.memory_space<vmem>>, %arg4: memref<1x96x128xbf16, #tpu.memory_space<vmem>>, %arg5: memref<8x128xf32, #tpu.memory_space<vmem>>) attributes {dimension_semantics = [#tpu.dimension_semantics<parallel>], iteration_bounds = array<i64: 1>, scalar_prefetch = 1 : i64, scratch_operands = 0 : i64, tpu.core_type = #tpu.core_type<tc>, window_params = [{transform_indices = @transform_0, window_bounds = array<i64: 8, 16>}, {pipeline_mode = #tpu.pipeline_mode<synchronous>, transform_indices = @transform_1, window_bounds = array<i64: 128, 128>}, {transform_indices = @transform_2, window_bounds = array<i64: 1, 96, 128>}, {transform_indices = @transform_3, window_bounds = array<i64: 8, 128>}]} {
    %c0 = arith.constant 0 : index
    %c0_0 = arith.constant 0 : index
    %0 = vector.load %arg2[%c0, %c0_0] : memref<8x16xf32, #tpu.memory_space<vmem>>, vector<8x16xf32>
    %c0_1 = arith.constant 0 : index
    %c0_2 = arith.constant 0 : index
    %1 = vector.load %arg3[%c0_1, %c0_2] : memref<128x128xbf16, #tpu.memory_space<vmem>>, vector<16x128xbf16>
    %c16 = arith.constant 16 : index
    %c0_3 = arith.constant 0 : index
    %2 = vector.load %arg3[%c16, %c0_3] : memref<128x128xbf16, #tpu.memory_space<vmem>>, vector<1x128xbf16>
    %3 = arith.extf %2 : vector<1x128xbf16> to vector<1x128xf32>
    %4 = arith.truncf %0 : vector<8x16xf32> to vector<8x16xbf16>
    %cst = arith.constant dense<0.000000e+00> : vector<8x128xf32>
    %5 = tpu.matmul %4, %1, %cst {dimension_numbers = #tpu.dot_dimension_numbers<[1], [0], [0], [1], [0, 0, 1, 1], [], []>} : vector<8x16xbf16>, vector<16x128xbf16>, vector<8x128xf32> -> vector<8x128xf32>
    %6 = vector.broadcast %3 : vector<1x128xf32> to vector<8x128xf32>
    %7 = arith.addf %5, %6 : vector<8x128xf32>
    %cst_4 = arith.constant 0.000000e+00 : f32
    %8 = vector.broadcast %cst_4 : f32 to vector<8x128xf32>
    %9 = arith.maximumf %7, %8 : vector<8x128xf32>
    %10 = vector.extract_strided_slice %9 {offsets = [0, 0], sizes = [8, 32], strides = [1, 1]} : vector<8x128xf32> to vector<8x32xf32>
    %c32 = arith.constant 32 : index
    %c0_5 = arith.constant 0 : index
    %11 = vector.load %arg3[%c32, %c0_5] : memref<128x128xbf16, #tpu.memory_space<vmem>>, vector<32x128xbf16>
    %c64 = arith.constant 64 : index
    %c0_6 = arith.constant 0 : index
    %12 = vector.load %arg3[%c64, %c0_6] : memref<128x128xbf16, #tpu.memory_space<vmem>>, vector<1x128xbf16>
    %13 = arith.extf %12 : vector<1x128xbf16> to vector<1x128xf32>
    %14 = arith.truncf %10 : vector<8x32xf32> to vector<8x32xbf16>
    %cst_7 = arith.constant dense<0.000000e+00> : vector<8x128xf32>
    %15 = tpu.matmul %14, %11, %cst_7 {dimension_numbers = #tpu.dot_dimension_numbers<[1], [0], [0], [1], [0, 0, 1, 1], [], []>} : vector<8x32xbf16>, vector<32x128xbf16>, vector<8x128xf32> -> vector<8x128xf32>
    %16 = vector.broadcast %13 : vector<1x128xf32> to vector<8x128xf32>
    %17 = arith.addf %15, %16 : vector<8x128xf32>
    %cst_8 = arith.constant 0.000000e+00 : f32
    %18 = vector.broadcast %cst_8 : f32 to vector<8x128xf32>
    %19 = arith.maximumf %17, %18 : vector<8x128xf32>
    %20 = vector.extract_strided_slice %19 {offsets = [0, 0], sizes = [8, 32], strides = [1, 1]} : vector<8x128xf32> to vector<8x32xf32>
    %c80 = arith.constant 80 : index
    %c0_9 = arith.constant 0 : index
    %21 = vector.load %arg3[%c80, %c0_9] : memref<128x128xbf16, #tpu.memory_space<vmem>>, vector<32x128xbf16>
    %c112 = arith.constant 112 : index
    %c0_10 = arith.constant 0 : index
    %22 = vector.load %arg3[%c112, %c0_10] : memref<128x128xbf16, #tpu.memory_space<vmem>>, vector<1x128xbf16>
    %23 = arith.extf %22 : vector<1x128xbf16> to vector<1x128xf32>
    %24 = arith.truncf %20 : vector<8x32xf32> to vector<8x32xbf16>
    %cst_11 = arith.constant dense<0.000000e+00> : vector<8x128xf32>
    %25 = tpu.matmul %24, %21, %cst_11 {dimension_numbers = #tpu.dot_dimension_numbers<[1], [0], [0], [1], [0, 0, 1, 1], [], []>} : vector<8x32xbf16>, vector<32x128xbf16>, vector<8x128xf32> -> vector<8x128xf32>
    %26 = vector.broadcast %23 : vector<1x128xf32> to vector<8x128xf32>
    %27 = arith.addf %25, %26 : vector<8x128xf32>
    %cst_12 = arith.constant 0.000000e+00 : f32
    %28 = vector.broadcast %cst_12 : f32 to vector<8x128xf32>
    %29 = arith.maximumf %27, %28 : vector<8x128xf32>
    %30 = vector.extract_strided_slice %29 {offsets = [0, 0], sizes = [8, 32], strides = [1, 1]} : vector<8x128xf32> to vector<8x32xf32>
    %c0_13 = arith.constant 0 : index
    %c0_14 = arith.constant 0 : index
    %c0_15 = arith.constant 0 : index
    %31 = vector.load %arg4[%c0_13, %c0_14, %c0_15] : memref<1x96x128xbf16, #tpu.memory_space<vmem>>, vector<1x32x128xbf16>
    %32 = vector.shape_cast %31 : vector<1x32x128xbf16> to vector<32x128xbf16>
    %c0_16 = arith.constant 0 : index
    %c32_17 = arith.constant 32 : index
    %c0_18 = arith.constant 0 : index
    %33 = vector.load %arg4[%c0_16, %c32_17, %c0_18] : memref<1x96x128xbf16, #tpu.memory_space<vmem>>, vector<1x1x128xbf16>
    %34 = vector.shape_cast %33 : vector<1x1x128xbf16> to vector<1x128xbf16>
    %35 = arith.extf %34 : vector<1x128xbf16> to vector<1x128xf32>
    %36 = arith.truncf %30 : vector<8x32xf32> to vector<8x32xbf16>
    %cst_19 = arith.constant dense<0.000000e+00> : vector<8x128xf32>
    %37 = tpu.matmul %36, %32, %cst_19 {dimension_numbers = #tpu.dot_dimension_numbers<[1], [0], [0], [1], [0, 0, 1, 1], [], []>} : vector<8x32xbf16>, vector<32x128xbf16>, vector<8x128xf32> -> vector<8x128xf32>
    %38 = vector.broadcast %35 : vector<1x128xf32> to vector<8x128xf32>
    %39 = arith.addf %37, %38 : vector<8x128xf32>
    %cst_20 = arith.constant 0.000000e+00 : f32
    %40 = vector.broadcast %cst_20 : f32 to vector<8x128xf32>
    %41 = arith.maximumf %39, %40 : vector<8x128xf32>
    %42 = vector.extract_strided_slice %41 {offsets = [0, 0], sizes = [8, 32], strides = [1, 1]} : vector<8x128xf32> to vector<8x32xf32>
    %c0_21 = arith.constant 0 : index
    %c48 = arith.constant 48 : index
    %c0_22 = arith.constant 0 : index
    %43 = vector.load %arg4[%c0_21, %c48, %c0_22] : memref<1x96x128xbf16, #tpu.memory_space<vmem>>, vector<1x32x128xbf16>
    %44 = vector.shape_cast %43 : vector<1x32x128xbf16> to vector<32x128xbf16>
    %c0_23 = arith.constant 0 : index
    %c80_24 = arith.constant 80 : index
    %c0_25 = arith.constant 0 : index
    %45 = vector.load %arg4[%c0_23, %c80_24, %c0_25] : memref<1x96x128xbf16, #tpu.memory_space<vmem>>, vector<1x1x128xbf16>
    %46 = vector.shape_cast %45 : vector<1x1x128xbf16> to vector<1x128xbf16>
    %47 = arith.extf %46 : vector<1x128xbf16> to vector<1x128xf32>
    %48 = arith.truncf %42 : vector<8x32xf32> to vector<8x32xbf16>
    %cst_26 = arith.constant dense<0.000000e+00> : vector<8x128xf32>
    %49 = tpu.matmul %48, %44, %cst_26 {dimension_numbers = #tpu.dot_dimension_numbers<[1], [0], [0], [1], [0, 0, 1, 1], [], []>} : vector<8x32xbf16>, vector<32x128xbf16>, vector<8x128xf32> -> vector<8x128xf32>
    %50 = vector.broadcast %47 : vector<1x128xf32> to vector<8x128xf32>
    %51 = arith.addf %49, %50 : vector<8x128xf32>
    %c0_27 = arith.constant 0 : index
    %c0_28 = arith.constant 0 : index
    %52 = vector.load %arg5[%c0_27, %c0_28] : memref<8x128xf32, #tpu.memory_space<vmem>>, vector<8x128xf32>
    tpu.vector_store %arg5[%c0_27, %c0_28], %51 {strides = array<i32>} : memref<8x128xf32, #tpu.memory_space<vmem>>, vector<8x128xf32>,
    return
  }
  func.func @transform_0(%arg0: i32, %arg1: memref<1xi32, #tpu.memory_space<smem>>) -> (i32, i32) {
    %c0_i32 = arith.constant 0 : i32
    %c0_i32_0 = arith.constant 0 : i32
    return %arg0, %c0_i32 : i32, i32
  }
  func.func @transform_1(%arg0: i32, %arg1: memref<1xi32, #tpu.memory_space<smem>>) -> (i32, i32) {
    %c0_i32 = arith.constant 0 : i32
    %c0_i32_0 = arith.constant 0 : i32
    %c0_i32_1 = arith.constant 0 : i32
    return %c0_i32, %c0_i32_0 : i32, i32
  }
  func.func @transform_2(%arg0: i32, %arg1: memref<1xi32, #tpu.memory_space<smem>>) -> (i32, i32, i32) {
    %c0 = arith.constant 0 : index
    %0 = memref.load %arg1[%c0] : memref<1xi32, #tpu.memory_space<smem>>
    %c0_i32 = arith.constant 0 : i32
    %c0_i32_0 = arith.constant 0 : i32
    %c0_i32_1 = arith.constant 0 : i32
    return %0, %c0_i32, %c0_i32_0 : i32, i32, i32
  }
  func.func @transform_3(%arg0: i32, %arg1: memref<1xi32, #tpu.memory_space<smem>>) -> (i32, i32) {
    %c0_i32 = arith.constant 0 : i32
    %c0_i32_0 = arith.constant 0 : i32
    return %arg0, %c0_i32 : i32, i32
  }
}

</mosaic_0001>

<bundles_post_ra>
// kernel: _forward_impl.1
= control target key start
LH: loop header
LB: loop body
LE: loop exit
PB: predicated region body
PF: predicated region fallthrough
CT: control target
= control target key end

     0   :  { %10 = vsyncpa [#allocation5], 0  ;;  %s443_s0 = inlined_call_operand.<no memory space> [shape: s32[1], index: 0, kind: input, shape index: {}]   ;;  %s444_s1 = inlined_call_operand.hbm [shape: f32[8,16], index: 1, kind: input, shape index: {}]   ;;  %s445_s2 = inlined_call_operand.hbm [shape: bf16[128,128], index: 2, kind: input, shape index: {}]   ;;  %s446_s3 = inlined_call_operand.hbm [shape: bf16[2,96,128], index: 3, kind: input, shape index: {}]   ;;  %s447_s4 = inlined_call_operand.vmem [shape: f32[8,128], index: 4, kind: output, shape index: {}]  }
   0x1   :  { %11 = vsyncpa [#allocation7], 0  ;;  %s27_s17 = sshll.u32 %s445_s2, 4  ;;  %s388_s18 = smov [#allocation6]   ;;  %s28_s17 = int_to_ptr.hbm [resolvable:$true] %s27_s17 }
   0x2   :  { %s29_s19 = sshll.u32 %s388_s18, 4  ;;  %s17_s22 = sshll.u32 %s444_s1, 4  ;;  %s30_s19 = int_to_ptr.vmem [resolvable:$true] %s29_s19  ;;  %s18_s22 = int_to_ptr.hbm [resolvable:$true] %s17_s22 }
   0x3   :  { %s389_s23 = smov 64   ;;  %s390_s24 = smov 4  }
   0x4   :  { %35 = dma.hbm_to_vmem [thread:$0]  %s28_s17, 1024, %s30_s19, [#allocation7], %s389_s23, %s389_s23, %s390_s24  }
   0x5   :  { %s391_s25 = smov [#allocation4]   ;;  %s306_s29 = smul.u32 48, %s443_s0 }
   0x6   :  { %s19_s26 = sshll.u32 %s391_s25, 4  ;;  %s392_s6 = smov [#allocation8]   ;;  %s20_s26 = int_to_ptr.vmem [resolvable:$true] %s19_s26 }
   0x7   :  { %22 = dma.hbm_to_vmem [thread:$0]  %s18_s22, 128, %s20_s26, [#allocation5]  }
   0x8   :  { %s43_s5 = scalar_lea.hbm %s446_s3, %s306_s29  ;;  %s46_s7 = sshll.u32 %s392_s6, 4  ;;  %s47_s7 = int_to_ptr.vmem [resolvable:$true] %s46_s7 }
   0x9   :  { %s44_s8 = sshll.u32 %s43_s5, 4  ;;  %s364_s12 = scalar_lea.hbm %s446_s3, 96  ;;  %s45_s8 = int_to_ptr.hbm [resolvable:$true] %s44_s8 }
   0xa   :  { %s360_s1 = sshra.s32 %s45_s8, 4  ;;  %s361_s1 = int_to_ptr.hbm [resolvable:$true] %s360_s1 }
   0xb   :  { %s362_s9 = scalar_lea.hbm %s361_s1, 48  ;;  %p365_p1 = scmp.lt.s32.totalorder %s361_s1, %s446_s3 }
   0xc   :  { %p363_p0 = scmp.ne.s32.totalorder %s361_s1, %s362_s9  ;;  %p366_p2 = scmp.lt.s32.totalorder %s364_s12, %s362_s9 }
   0xe   :  { %p367_p3 = por %p366_p2, %p365_p1 }
  0x10   :  { %p368_p4 = pnand %p367_p3, %p363_p0 }
  0x12   :  { %371 = shalt.err (!%p368_p4)
}
  0x13   :  { %52 = dma.hbm_to_vmem [thread:$0]  %s45_s8, 768, %s47_s7, [#allocation7], %s389_s23, %s389_s23, %s390_s24  }
  0x14   :  { %384 = dma.done.wait [#allocation5], 128  }
  0x15   :  { %385 = vsyncadd [#allocation5], 4294967168 }
  0x16   :  { %386 = dma.done.wait [#allocation7], 1792  }
  0x17   :  { %387 = vsyncadd [#allocation7], 4294965504  ;;  %v297_v0 = vld [vmem:[#allocation6] sm:$0xff]  ;;  %v67_v1 = vld [vmem:[#allocation4] sm:$0xff]  ;;  %vm80_vm0 = vcmask 130048   ;;  %vm118_vm1 = vcmask 261120  }
  0x18   :  { %v72_v2 = vpack.c.bf16 %v67_v1, %v67_v1  ;;  %91 = vmatpush.bf16.msra.mxu0 %v297_v0  ;;  %v299_v3 = vld [vmem:[#allocation6 + $0x18] sm:$0xff]  ;;  %v298_v4 = vld [vmem:[#allocation6 + $0x10] sm:$0xff]  ;;  %v70_v5 = vld [vmem:[#allocation6 + $0x8] sm:$0x1] }
  0x19   :  { %128 = vmatpush.bf16.msra.mxu1 %v299_v3  ;;  %v71_v6 = vunpack.c.l.bf16 %v70_v5  ;;  %v301_v13 = vld [vmem:[#allocation6 + $0x30] sm:$0xff]  ;;  %v300_v14 = vld [vmem:[#allocation6 + $0x28] sm:$0xff]  ;;  %v102_v15 = vld [vmem:[#allocation6 + $0x20] sm:$0x1] }
  0x1a   :  { %165 = vmatpush.bf16.msra.mxu2 %v301_v13  ;;  %v103_v16 = vunpack.c.l.bf16 %v102_v15  ;;  %v303_v23 = vld [vmem:[#allocation8 + $0x8] sm:$0xff]  ;;  %v302_v24 = vld [vmem:[#allocation8] sm:$0xff]  ;;  %v304_v26 = vld [vmem:[#allocation8 + $0x18] sm:$0xff] }
  0x1b   :  { %260 = vmatmul.msk.bf16.vlgmr.msra.gmra.mxu0 %vm80_vm0, %v72_v2  ;;  %v73_v7 = vperm.slane %v71_v6, 0  ;;  %202 = vmatpush.bf16.msra.mxu3 %v303_v23  ;;  %v305_v25 = vld [vmem:[#allocation8 + $0x20] sm:$0xff]  ;;  %v140_v27 = vld [vmem:[#allocation6 + $0x38] sm:$0x1]  ;;  %v177_v35 = vld [vmem:[#allocation8 + $0x10] sm:$0x1] }
  0x1c   :  { %v105_v17 = vperm.slane %v103_v16, 0  ;;  %239 = vmatpush.bf16.msrb.mxu0 %v305_v25  ;;  %v141_v28 = vunpack.c.l.bf16 %v140_v27  ;;  %v178_v36 = vunpack.c.l.bf16 %v177_v35  ;;  %v214_v43 = vld [vmem:[#allocation8 + $0x28] sm:$0x1] }
  0x1d   :  { %129 = vmatpush.bf16.msra.mxu1 %v298_v4  ;;  %v215_v44 = vunpack.c.l.bf16 %v214_v43 }
  0x1e   :  { %166 = vmatpush.bf16.msra.mxu2 %v300_v14  ;;  %v143_v29 = vperm.slane %v141_v28, 0  ;;  %v180_v37 = vperm.slane %v178_v36, 0 }
  0x1f   :  { %203 = vmatpush.bf16.msra.mxu3 %v302_v24  ;;  %v217_v45 = vperm.slane %v215_v44, 0 }
  0x20   :  { %240 = vmatpush.bf16.msrb.mxu0 %v304_v26 }
  0x98   :  { %v93_v8 = vpop.f32.mrf.mxu0 }
  0x99   :  { %v94_v9 = vadd.f32 %v93_v8, %v73_v7 }
  0x9b   :  { %v97_v10 = vmax.f32 %v94_v9, 0.0 }
  0x9d   :  { %v104_v11 = vpack.c.bf16 %v97_v10, %v97_v10 }
  0x9f   :  { %269 = vmatmul.msk.bf16.vlgmr.msra.gmra.mxu1 %vm118_vm1, %v104_v11 }
  0xa0   :  { %v95_v12 = vpop.f32.mrf.mxu0 }
 0x11c   :  { %v131_v18 = vpop.f32.mrf.mxu1 }
 0x11d   :  { %v132_v19 = vadd.f32 %v131_v18, %v105_v17 }
 0x11f   :  { %v135_v20 = vmax.f32 %v132_v19, 0.0 }
 0x121   :  { %v142_v21 = vpack.c.bf16 %v135_v20, %v135_v20 }
 0x123   :  { %278 = vmatmul.msk.bf16.vlgmr.msra.gmra.mxu2 %vm118_vm1, %v142_v21 }
 0x124   :  { %v133_v22 = vpop.f32.mrf.mxu1 }
 0x1a6   :  { %v168_v30 = vpop.f32.mrf.mxu2 }
 0x1a7   :  { %v169_v31 = vadd.f32 %v168_v30, %v143_v29 }
 0x1a9   :  { %v172_v32 = vmax.f32 %v169_v31, 0.0 }
 0x1ab   :  { %v179_v33 = vpack.c.bf16 %v172_v32, %v172_v32 }
 0x1ad   :  { %287 = vmatmul.msk.bf16.vlgmr.msra.gmra.mxu3 %vm118_vm1, %v179_v33 }
 0x1ae   :  { %v170_v34 = vpop.f32.mrf.mxu2 }
 0x230   :  { %v205_v38 = vpop.f32.mrf.mxu3 }
 0x231   :  { %v206_v39 = vadd.f32 %v205_v38, %v180_v37 }
 0x233   :  { %v209_v40 = vmax.f32 %v206_v39, 0.0 }
 0x235   :  { %v216_v41 = vpack.c.bf16 %v209_v40, %v209_v40 }
 0x237   :  { %296 = vmatmul.msk.bf16.vlgmr.msrb.gmra.mxu0 %vm118_vm1, %v216_v41 }
 0x238   :  { %v207_v42 = vpop.f32.mrf.mxu3 }
 0x2b4   :  { %v242_v46 = vpop.f32.mrf.mxu0 }
 0x2b5   :  { %v243_v47 = vadd.f32 %v242_v46, %v217_v45 }
 0x2b7   :  { %246 = vst [vmem:[%s447_s4] sm:$0xff] %v243_v47 }
 0x2bc   :  { %v244_v48 = vpop.f32.mrf.mxu0 }
 0x2bd   :  { %251 = vsyncpa [#allocation5], 1 }
 0x2be   :  { %252 = vsyncpa [#allocation7], 1 }

</bundles_post_ra>
